<compile_context>
chip_gen: v6e
topology: v6e:2x2x1
jax: 0.10.0
libtpu: 0.0.40
codegen_flags: <defaults>
</compile_context>

<pallas_src>
import functools

import jax
import jax.numpy as jnp
from jax import lax
from jax.experimental import pallas as pl
from jax.experimental.pallas import tpu as pltpu

POOL_K = 31
POOL_PAD = 15
NCORES = 2  # megacore split; harmless (sequential) on 1-TC chips


def _sum_hw(x):
    """(P, H, W) -> (P, 1, 1) sum over the spatial dims (two-stage reduce)."""
    return jnp.sum(jnp.sum(x, axis=2, keepdims=True), axis=1, keepdims=True)


def _dice_loss_kernel(pred_ref, mask_ref, out_ref, bh_ref, bw_ref, *,
                      nc, inv_count):
    c = pl.program_id(0)          # core index (parallel axis)
    i = pl.program_id(1)          # plane-batch step (arbitrary axis)
    steps = pl.num_programs(1)

    @pl.when(i == 0)
    def _():
        # zero this core's partial-sum block
        out_ref[...] = jnp.zeros_like(out_ref)
        # build banded box-filter matrices once per core (bf16, entries 0/1)
        rh = lax.broadcasted_iota(jnp.int32, bh_ref.shape, 0)
        ch = lax.broadcasted_iota(jnp.int32, bh_ref.shape, 1)
        bh_ref[...] = (jnp.abs(rh - ch) <= POOL_PAD).astype(jnp.bfloat16)
        rw = lax.broadcasted_iota(jnp.int32, bw_ref.shape, 0)
        cw = lax.broadcasted_iota(jnp.int32, bw_ref.shape, 1)
        bw_ref[...] = (jnp.abs(rw - cw) <= POOL_PAD).astype(jnp.bfloat16)

    m = mask_ref[...]             # (P, H, W) f32
    p = pred_ref[...]             # (P, H, W) f32
    P, H, W = m.shape

    # ---- AvgPool2d(31, stride=1, pad=15, count_include_pad=True) ----
    # bf16 matmuls with f32 accumulation (exact for binary masks).
    m16 = m.astype(jnp.bfloat16)
    # horizontal box-sum: one big MXU matmul (P*H, W) @ (W, W)
    row_sum = jnp.dot(m16.reshape(P * H, W), bw_ref[...],
                      preferred_element_type=jnp.float32)
    # vertical box-sum: batched (H, H) @ (H, W) matmuls
    bh_b = jnp.broadcast_to(bh_ref[...][None, :, :], (P, H, H))
    pooled = jnp.einsum(
        'phk,pkw->phw', bh_b,
        row_sum.reshape(P, H, W).astype(jnp.bfloat16),
        preferred_element_type=jnp.float32) * inv_count

    # ---- weighted dice terms ----
    weit = 1.0 + 5.0 * jnp.abs(pooled - m)
    ps = jax.nn.sigmoid(p)
    a = weit * ps
    inter = _sum_hw(a * m)                                   # (P, 1, 1)
    union = _sum_hw(a) + _sum_hw(weit * m)                   # (P, 1, 1)
    wdiss = 1.0 - (2.0 * inter + 0.5) * pl.reciprocal(union + 0.5, approx=True)

    # mask out padded planes (global plane id >= nc)
    blk = c * steps + i
    pid = blk * P + lax.broadcasted_iota(jnp.int32, (P, 1, 1), 0)
    wdiss = jnp.where(pid < nc, wdiss, 0.0)

    # single accumulator touch per (batched) step; scalar broadcast fills the
    # lane-dense (1, 8, 128) block (wrapper reads element [0, 0]).
    out_ref[...] = out_ref[...] + jnp.sum(wdiss)


def dice_loss(pred, mask):
    """pred, mask: (N, C, H, W) float arrays (NCHW). Returns scalar loss."""
    N, C, H, W = pred.shape
    nc = N * C
    pred_f = pred.reshape(nc, H, W).astype(jnp.float32)
    mask_f = mask.reshape(nc, H, W).astype(jnp.float32)

    # --- choose plane batch P: ~2 MiB per input block, cap at 64 planes,
    # and no more than one core's share of planes ---
    bytes_per_plane = H * W * 4
    P = int(max(1, min(64,
                       (2 * 1024 * 1024) // bytes_per_plane,
                       -(-nc // NCORES))))
    steps = -(-nc // (NCORES * P))          # grid steps per core
    nc_pad = NCORES * P * steps
    if nc_pad != nc:
        pad = nc_pad - nc
        zpad = jnp.zeros((pad, H, W), jnp.float32)
        pred_f = jnp.concatenate([pred_f, zpad], axis=0)
        mask_f = jnp.concatenate([mask_f, zpad], axis=0)

    kernel = functools.partial(
        _dice_loss_kernel,
        nc=nc,
        inv_count=1.0 / float(POOL_K * POOL_K),
    )

    out = pl.pallas_call(
        kernel,
        out_shape=jax.ShapeDtypeStruct((NCORES, 8, 128), jnp.float32),
        grid_spec=pltpu.PrefetchScalarGridSpec(
            num_scalar_prefetch=0,
            grid=(NCORES, steps),
            in_specs=[
                pl.BlockSpec((P, H, W), lambda c, i, s=steps: (c * s + i, 0, 0)),
                pl.BlockSpec((P, H, W), lambda c, i, s=steps: (c * s + i, 0, 0)),
            ],
            out_specs=pl.BlockSpec((1, 8, 128), lambda c, i: (c, 0, 0)),
            scratch_shapes=[
                pltpu.VMEM((H, H), jnp.bfloat16),   # vertical band matrix
                pltpu.VMEM((W, W), jnp.bfloat16),   # horizontal band matrix
            ],
        ),
        compiler_params=pltpu.CompilerParams(
            dimension_semantics=("parallel", "arbitrary"),
            vmem_limit_bytes=48 * 1024 * 1024,
        ),
    )(pred_f, mask_f)

    # sum the per-core partials, then mean over the true number of planes
    return jnp.sum(out[:, 0, 0]) / float(nc)


def _dice_loss_ref(pred, mask):
    """Pure-JAX reference mirroring the PyTorch module."""
    pooled = lax.reduce_window(
        mask, 0.0, lax.add,
        (1, 1, POOL_K, POOL_K), (1, 1, 1, 1),
        ((0, 0), (0, 0), (POOL_PAD, POOL_PAD), (POOL_PAD, POOL_PAD)),
    ) / float(POOL_K * POOL_K)
    weit = 1.0 + 5.0 * jnp.abs(pooled - mask)
    ps = jax.nn.sigmoid(pred)
    inter = jnp.sum(ps * mask * weit, axis=(2, 3))
    union = jnp.sum((ps + mask) * weit, axis=(2, 3))
    wdiss = 1.0 - (2.0 * inter + 0.5) / (union + 0.5)
    return jnp.mean(wdiss)


if __name__ == "__main__":
    key = jax.random.PRNGKey(0)
    k1, k2 = jax.random.split(key)
    N, C, H, W = 2, 4, 16, 16
    pred = jax.random.normal(k1, (N, C, H, W), dtype=jnp.float32)
    mask = (jax.random.uniform(k2, (N, C, H, W), dtype=jnp.float32) > 0.5
            ).astype(jnp.float32)

    loss = jax.jit(dice_loss)(pred, mask)
    jax.block_until_ready(loss)

    ref = _dice_loss_ref(pred, mask)
    assert jnp.allclose(loss, ref, rtol=2e-3, atol=2e-3), (loss, ref)
    print("KERNEL_OK")
</pallas_src>

<mosaic_0001>
module attributes {stable_mosaic.version = 11 : i64} {
  func.func @_dice_loss_kernel(%arg0: i32, %arg1: i32, %arg2: memref<4x16x16xf32, #tpu.memory_space<vmem>>, %arg3: memref<4x16x16xf32, #tpu.memory_space<vmem>>, %arg4: memref<1x8x128xf32, #tpu.memory_space<vmem>>, %arg5: memref<16x16xbf16, #tpu.memory_space<vmem>>, %arg6: memref<16x16xbf16, #tpu.memory_space<vmem>>) attributes {dimension_semantics = [#tpu.dimension_semantics<parallel>, #tpu.dimension_semantics<arbitrary>], iteration_bounds = array<i64: 2, 1>, scalar_prefetch = 0 : i64, scratch_operands = 2 : i64, tpu.core_type = #tpu.core_type<tc>, window_params = [{transform_indices = @transform_0, window_bounds = array<i64: 4, 16, 16>}, {transform_indices = @transform_1, window_bounds = array<i64: 4, 16, 16>}, {transform_indices = @transform_2, window_bounds = array<i64: 1, 8, 128>}]} {
    %c0_i32 = arith.constant 0 : i32
    %0 = arith.cmpi eq, %arg1, %c0_i32 : i32
    %1 = arith.extui %0 : i1 to i32
    %c0_i32_0 = arith.constant 0 : i32
    %2 = arith.cmpi ne, %1, %c0_i32_0 : i32
    scf.if %2 {
      %cst_33 = arith.constant 0.000000e+00 : f32
      %73 = vector.broadcast %cst_33 : f32 to vector<1x8x128xf32>
      %c0_34 = arith.constant 0 : index
      %c0_35 = arith.constant 0 : index
      %c0_36 = arith.constant 0 : index
      %74 = vector.load %arg4[%c0_34, %c0_35, %c0_36] : memref<1x8x128xf32, #tpu.memory_space<vmem>>, vector<1x8x128xf32>
      tpu.vector_store %arg4[%c0_34, %c0_35, %c0_36], %73 {strides = array<i32>} : memref<1x8x128xf32, #tpu.memory_space<vmem>>, vector<1x8x128xf32>,
      %75 = tpu.iota {dimensions = array<i32: 0>} : vector<16x16xi32>
      %76 = tpu.iota {dimensions = array<i32: 1>} : vector<16x16xi32>
      %77 = arith.subi %75, %76 : vector<16x16xi32>
      %78 = math.absi %77 : vector<16x16xi32>
      %c15_i32 = arith.constant 15 : i32
      %79 = vector.broadcast %c15_i32 : i32 to vector<16x16xi32>
      %80 = arith.cmpi sle, %78, %79 : vector<16x16xi32>
      %81 = arith.extui %80 : vector<16x16xi1> to vector<16x16xi32>
      %82 = arith.sitofp %81 : vector<16x16xi32> to vector<16x16xf32>
      %83 = arith.truncf %82 : vector<16x16xf32> to vector<16x16xbf16>
      %c0_37 = arith.constant 0 : index
      %c0_38 = arith.constant 0 : index
      %84 = vector.load %arg5[%c0_37, %c0_38] : memref<16x16xbf16, #tpu.memory_space<vmem>>, vector<16x16xbf16>
      tpu.vector_store %arg5[%c0_37, %c0_38], %83 {strides = array<i32>} : memref<16x16xbf16, #tpu.memory_space<vmem>>, vector<16x16xbf16>,
      %85 = tpu.iota {dimensions = array<i32: 0>} : vector<16x16xi32>
      %86 = tpu.iota {dimensions = array<i32: 1>} : vector<16x16xi32>
      %87 = arith.subi %85, %86 : vector<16x16xi32>
      %88 = math.absi %87 : vector<16x16xi32>
      %c15_i32_39 = arith.constant 15 : i32
      %89 = vector.broadcast %c15_i32_39 : i32 to vector<16x16xi32>
      %90 = arith.cmpi sle, %88, %89 : vector<16x16xi32>
      %91 = arith.extui %90 : vector<16x16xi1> to vector<16x16xi32>
      %92 = arith.sitofp %91 : vector<16x16xi32> to vector<16x16xf32>
      %93 = arith.truncf %92 : vector<16x16xf32> to vector<16x16xbf16>
      %c0_40 = arith.constant 0 : index
      %c0_41 = arith.constant 0 : index
      %94 = vector.load %arg6[%c0_40, %c0_41] : memref<16x16xbf16, #tpu.memory_space<vmem>>, vector<16x16xbf16>
      tpu.vector_store %arg6[%c0_40, %c0_41], %93 {strides = array<i32>} : memref<16x16xbf16, #tpu.memory_space<vmem>>, vector<16x16xbf16>,
    } else {
    }
    %c0 = arith.constant 0 : index
    %c0_1 = arith.constant 0 : index
    %c0_2 = arith.constant 0 : index
    %3 = vector.load %arg3[%c0, %c0_1, %c0_2] : memref<4x16x16xf32, #tpu.memory_space<vmem>>, vector<4x16x16xf32>
    %c0_3 = arith.constant 0 : index
    %c0_4 = arith.constant 0 : index
    %c0_5 = arith.constant 0 : index
    %4 = vector.load %arg2[%c0_3, %c0_4, %c0_5] : memref<4x16x16xf32, #tpu.memory_space<vmem>>, vector<4x16x16xf32>
    %5 = arith.truncf %3 : vector<4x16x16xf32> to vector<4x16x16xbf16>
    %6 = vector.shape_cast %5 : vector<4x16x16xbf16> to vector<64x16xbf16>
    %c0_6 = arith.constant 0 : index
    %c0_7 = arith.constant 0 : index
    %7 = vector.load %arg6[%c0_6, %c0_7] : memref<16x16xbf16, #tpu.memory_space<vmem>>, vector<16x16xbf16>
    %cst = arith.constant dense<0.000000e+00> : vector<64x16xf32>
    %8 = tpu.matmul %6, %7, %cst {dimension_numbers = #tpu.dot_dimension_numbers<[1], [0], [0], [1], [0, 0, 1, 1], [], []>} : vector<64x16xbf16>, vector<16x16xbf16>, vector<64x16xf32> -> vector<64x16xf32>
    %c0_8 = arith.constant 0 : index
    %c0_9 = arith.constant 0 : index
    %9 = vector.load %arg5[%c0_8, %c0_9] : memref<16x16xbf16, #tpu.memory_space<vmem>>, vector<16x16xbf16>
    %10 = vector.shape_cast %9 : vector<16x16xbf16> to vector<1x16x16xbf16>
    %11 = vector.shape_cast %10 : vector<1x16x16xbf16> to vector<1x16x16xbf16>
    %12 = vector.broadcast %11 : vector<1x16x16xbf16> to vector<4x16x16xbf16>
    %13 = vector.shape_cast %8 : vector<64x16xf32> to vector<4x16x16xf32>
    %14 = arith.truncf %13 : vector<4x16x16xf32> to vector<4x16x16xbf16>
    "tpu.trace_start"() <{level = 10 : i32, message = "phk,pkw->phw"}> : () -> ()
    %cst_10 = arith.constant dense<0.000000e+00> : vector<4x16x16xf32>
    %15 = tpu.matmul %12, %14, %cst_10 {dimension_numbers = #tpu.dot_dimension_numbers<[2], [1], [1], [2], [0, 0, 0, 1, 1, 2], [0], [0]>} : vector<4x16x16xbf16>, vector<4x16x16xbf16>, vector<4x16x16xf32> -> vector<4x16x16xf32>
    "tpu.trace_stop"() : () -> ()
    %cst_11 = arith.constant 0.00104058278 : f32
    %16 = vector.broadcast %cst_11 : f32 to vector<4x16x16xf32>
    %17 = arith.mulf %15, %16 : vector<4x16x16xf32>
    %18 = arith.subf %17, %3 : vector<4x16x16xf32>
    %19 = math.absf %18 : vector<4x16x16xf32>
    %cst_12 = arith.constant 5.000000e+00 : f32
    %20 = vector.broadcast %cst_12 : f32 to vector<4x16x16xf32>
    %21 = arith.mulf %20, %19 : vector<4x16x16xf32>
    %cst_13 = arith.constant 1.000000e+00 : f32
    %22 = vector.broadcast %cst_13 : f32 to vector<4x16x16xf32>
    %23 = arith.addf %22, %21 : vector<4x16x16xf32>
    %24 = arith.negf %4 : vector<4x16x16xf32>
    %25 = math.exp %24 : vector<4x16x16xf32>
    %cst_14 = arith.constant 1.000000e+00 : f32
    %26 = vector.broadcast %cst_14 : f32 to vector<4x16x16xf32>
    %27 = arith.addf %26, %25 : vector<4x16x16xf32>
    %28 = arith.divf %26, %27 : vector<4x16x16xf32>
    %29 = arith.mulf %23, %28 : vector<4x16x16xf32>
    %30 = arith.mulf %29, %3 : vector<4x16x16xf32>
    %cst_15 = arith.constant dense<0.000000e+00> : vector<4x16xf32>
    %31 = vector.multi_reduction <add>, %30, %cst_15 [2] : vector<4x16x16xf32> to vector<4x16xf32>
    %32 = vector.shape_cast %31 : vector<4x16xf32> to vector<4x16x1xf32>
    %cst_16 = arith.constant dense<0.000000e+00> : vector<4x1xf32>
    %33 = vector.multi_reduction <add>, %32, %cst_16 [1] : vector<4x16x1xf32> to vector<4x1xf32>
    %34 = vector.shape_cast %33 : vector<4x1xf32> to vector<4x1x1xf32>
    %cst_17 = arith.constant dense<0.000000e+00> : vector<4x16xf32>
    %35 = vector.multi_reduction <add>, %29, %cst_17 [2] : vector<4x16x16xf32> to vector<4x16xf32>
    %36 = vector.shape_cast %35 : vector<4x16xf32> to vector<4x16x1xf32>
    %cst_18 = arith.constant dense<0.000000e+00> : vector<4x1xf32>
    %37 = vector.multi_reduction <add>, %36, %cst_18 [1] : vector<4x16x1xf32> to vector<4x1xf32>
    %38 = vector.shape_cast %37 : vector<4x1xf32> to vector<4x1x1xf32>
    %39 = arith.mulf %23, %3 : vector<4x16x16xf32>
    %cst_19 = arith.constant dense<0.000000e+00> : vector<4x16xf32>
    %40 = vector.multi_reduction <add>, %39, %cst_19 [2] : vector<4x16x16xf32> to vector<4x16xf32>
    %41 = vector.shape_cast %40 : vector<4x16xf32> to vector<4x16x1xf32>
    %cst_20 = arith.constant dense<0.000000e+00> : vector<4x1xf32>
    %42 = vector.multi_reduction <add>, %41, %cst_20 [1] : vector<4x16x1xf32> to vector<4x1xf32>
    %43 = vector.shape_cast %42 : vector<4x1xf32> to vector<4x1x1xf32>
    %44 = arith.addf %38, %43 : vector<4x1x1xf32>
    %cst_21 = arith.constant 2.000000e+00 : f32
    %45 = vector.broadcast %cst_21 : f32 to vector<4x1x1xf32>
    %46 = arith.mulf %45, %34 : vector<4x1x1xf32>
    %cst_22 = arith.constant 5.000000e-01 : f32
    %47 = vector.broadcast %cst_22 : f32 to vector<4x1x1xf32>
    %48 = arith.addf %46, %47 : vector<4x1x1xf32>
    %cst_23 = arith.constant 5.000000e-01 : f32
    %49 = vector.broadcast %cst_23 : f32 to vector<4x1x1xf32>
    %50 = arith.addf %44, %49 : vector<4x1x1xf32>
    %51 = tpu.reciprocal %50 {approx = true} : vector<4x1x1xf32> -> vector<4x1x1xf32>
    %52 = arith.mulf %48, %51 : vector<4x1x1xf32>
    %cst_24 = arith.constant 1.000000e+00 : f32
    %53 = vector.broadcast %cst_24 : f32 to vector<4x1x1xf32>
    %54 = arith.subf %53, %52 : vector<4x1x1xf32>
    %c1_i32 = arith.constant 1 : i32
    %55 = arith.muli %arg0, %c1_i32 : i32
    %56 = arith.addi %55, %arg1 : i32
    %c4_i32 = arith.constant 4 : i32
    %57 = arith.muli %56, %c4_i32 : i32
    %58 = tpu.iota {dimensions = array<i32: 0>} : vector<4x1x1xi32>
    %59 = vector.broadcast %57 : i32 to vector<4x1x1xi32>
    %60 = arith.addi %59, %58 : vector<4x1x1xi32>
    %c8_i32 = arith.constant 8 : i32
    %61 = vector.broadcast %c8_i32 : i32 to vector<4x1x1xi32>
    %62 = arith.cmpi slt, %60, %61 : vector<4x1x1xi32>
    %cst_25 = arith.constant 0.000000e+00 : f32
    %63 = vector.broadcast %cst_25 : f32 to vector<4x1x1xf32>
    %64 = arith.select %62, %54, %63 : vector<4x1x1xi1>, vector<4x1x1xf32>
    %c0_26 = arith.constant 0 : index
    %c0_27 = arith.constant 0 : index
    %c0_28 = arith.constant 0 : index
    %65 = vector.load %arg4[%c0_26, %c0_27, %c0_28] : memref<1x8x128xf32, #tpu.memory_space<vmem>>, vector<1x8x128xf32>
    %66 = vector.shape_cast %64 : vector<4x1x1xf32> to vector<1x4x1x1xf32>
    %cst_29 = arith.constant dense<0.000000e+00> : vector<1xf32>
    %67 = vector.multi_reduction <add>, %66, %cst_29 [1, 2, 3] : vector<1x4x1x1xf32> to vector<1xf32>
    %68 = vector.shape_cast %67 : vector<1xf32> to vector<1x1x1x1xf32>
    %69 = vector.extract %68[0, 0, 0, 0] : f32 from vector<1x1x1x1xf32>
    %70 = vector.broadcast %69 : f32 to vector<1x8x128xf32>
    %71 = arith.addf %65, %70 : vector<1x8x128xf32>
    %c0_30 = arith.constant 0 : index
    %c0_31 = arith.constant 0 : index
    %c0_32 = arith.constant 0 : index
    %72 = vector.load %arg4[%c0_30, %c0_31, %c0_32] : memref<1x8x128xf32, #tpu.memory_space<vmem>>, vector<1x8x128xf32>
    tpu.vector_store %arg4[%c0_30, %c0_31, %c0_32], %71 {strides = array<i32>} : memref<1x8x128xf32, #tpu.memory_space<vmem>>, vector<1x8x128xf32>,
    return
  }
  func.func @transform_0(%arg0: i32, %arg1: i32) -> (i32, i32, i32) {
    %c1_i32 = arith.constant 1 : i32
    %0 = arith.muli %arg0, %c1_i32 : i32
    %1 = arith.addi %0, %arg1 : i32
    %c0_i32 = arith.constant 0 : i32
    %c0_i32_0 = arith.constant 0 : i32
    %c0_i32_1 = arith.constant 0 : i32
    return %1, %c0_i32, %c0_i32_0 : i32, i32, i32
  }
  func.func @transform_1(%arg0: i32, %arg1: i32) -> (i32, i32, i32) {
    %c1_i32 = arith.constant 1 : i32
    %0 = arith.muli %arg0, %c1_i32 : i32
    %1 = arith.addi %0, %arg1 : i32
    %c0_i32 = arith.constant 0 : i32
    %c0_i32_0 = arith.constant 0 : i32
    %c0_i32_1 = arith.constant 0 : i32
    return %1, %c0_i32, %c0_i32_0 : i32, i32, i32
  }
  func.func @transform_2(%arg0: i32, %arg1: i32) -> (i32, i32, i32) {
    %c0_i32 = arith.constant 0 : i32
    %c0_i32_0 = arith.constant 0 : i32
    %c0_i32_1 = arith.constant 0 : i32
    return %arg0, %c0_i32, %c0_i32_0 : i32, i32, i32
  }
}

</mosaic_0001>

<bundles_post_ra>
// kernel: dice_loss.1
= control target key start
LH: loop header
LB: loop body
LE: loop exit
PB: predicated region body
PF: predicated region fallthrough
CT: control target
= control target key end

     0   :  { %7 = vsyncpa [#allocation5], 0  ;;  %s1563_s0 = inlined_call_operand.hbm [shape: f32[8,16,16], index: 0, kind: input, shape index: {}]   ;;  %s1564_s1 = inlined_call_operand.hbm [shape: f32[8,16,16], index: 1, kind: input, shape index: {}]   ;;  %s1565_s2 = inlined_call_operand.vmem [shape: f32[2,8,128], index: 2, kind: output, shape index: {}]  }
   0x1   :  { %9 = vsyncpa [#allocation5 + $0x1], 0 }
   0x2   :  { %10 = vsyncpa [#allocation7], 0 }
   0x3   :  { %12 = vsyncpa [#allocation7 + $0x1], 0  ;;  %s1314_s9 = smov 0   ;;  %s1316_s10 = smov 0  }
   0x4   :  { %s1318_s11 = smov 0   ;;  %s1320_s12 = smov 0  }
   0x5   :  { %s1322_s13 = smov 0   ;;  %s1324_s14 = smov 0  }
   0x6 LB: > { %s977_s15 = sadd.s32 4294967295, %s1291_s14   ;;  %s30_s16 = sadd.s32 1, %s1287_s13  ;;  %s1291_s14 = sphi %s1324_s14, %s18_s14   ;;  %s1287_s13 = sphi %s1322_s13, %s1574_s13   ;;  %s1283_s12 = sphi %s1320_s12, %s1573_s12   ;;  %s1279_s11 = sphi %s1318_s11, %s1572_s11   ;;  %s1275_s10 = sphi %s1316_s10, %s1571_s10   ;;  %s1271_s9 = sphi %s1314_s9, %s1570_s9  }
   0x7   : > { %p32_p0 = scmp.ge.s32.totalorder %s30_s16, 2  ;;  %s39_s17 = sadd.s32 1, %s1279_s11 }
   0x8   : > { %p46_p1 = scmp.ne.s32.totalorder %s1279_s11, %s1275_s10  ;;  %p47_p2 = scmp.eq.s32.totalorder %s1291_s14, 0 }
   0x9   : > { %s1576_s16 = smov (%p32_p0, %s30_s16), 0  ;;  %p52_p4 = scmp.ne.s32.totalorder %s1275_s10, %s1271_s9 }
   0xa   : > { %p1350_p3 = por %p47_p2, %p46_p1  ;;  %s36_s19 = ssub.s32 %s1287_s13, %s1576_s16 }
   0xb   : > { %p53_p5 = scmp.eq.s32.totalorder %s977_s15, 0  ;;  %p37_p6 = scmp.eq.s32.totalorder %s36_s19, 0 }
   0xc   : > { %p1086_p8 = scmp.lt.s32.totalorder %s1291_s14, 2  ;;  %s1366_s22 = sand.u32 1, %s1279_s11  }
   0xd   : > { %p1357_p7 = por %p53_p5, %p52_p4  ;;  %s1021_s23 = sshll.u32 %s1287_s13, 10 }
   0xe   : > { %s1363_s21 = scalar_select %p37_p6, %s1279_s11, %s39_s17  }
   0xf   : > { %s981_s24 = sshll.u32 %s1366_s22, 6  ;;  %s142_s27 = scalar_lea.hbm %s1563_s0, %s1021_s23 }
  0x10   : > { %s134_s28 = scalar_lea.vmem [#allocation4], %s981_s24  ;;  %p1377_p9 = pnand %p1086_p8, %p1350_p3 }
  0x11   : > { %s143_s29 = sshll.u32 %s134_s28, 4  ;;  %s131_s3 = scalar_lea.sflag [#allocation5], %s1366_s22  ;;  %s144_s29 = int_to_ptr.vmem [resolvable:$true] %s143_s29 }
  0x12   : > { %p1183_p10 = pneg %p1377_p9  ;;  %s1194_s4 = scalar_lea.vmem %s144_s29, 1024 }
  0x13   : > { %p1195_p11 = scmp.ne.s32.totalorder %s144_s29, %s1194_s4  ;;  %s1293_s5 = smov [#allocation4]  }
  0x14   : > { %s1199_s6 = sshll.u32 %s1293_s5, 4  ;;  %s1200_s6 = int_to_ptr.vmem [resolvable:$false] %s1199_s6 }
  0x15   : > { %p1197_p12 = pnand %p1195_p11, %p1183_p10  ;;  %s1201_s7 = scalar_lea.vmem %s1200_s6, 2048 }
  0x16   : > { %p1202_p0 = scmp.lt.s32.totalorder %s144_s29, %s1200_s6  ;;  %p1203_p1 = scmp.lt.s32.totalorder %s1201_s7, %s1194_s4 }
  0x17   : > { %p1198_p13 = pneg %p1197_p12 }
  0x18   : > { %p1204_p2 = por %p1203_p1, %p1202_p0 }
  0x1a   : > { %p1205_p3 = pnand %p1204_p2, %p1198_p13 }
  0x1c   : > { %1208 = shalt.err (!%p1205_p3)
}
  0x1d   : > { %s1294_s8 = smov 128   ;;  %s1295_s9 = smov 8  }
  0x1e   : > { %1082 = dma.hbm_to_vmem [thread:$0]  (!%p1377_p9), %s142_s27, 1024, %s144_s29, %s131_s3, %s1294_s8, %s1294_s8, %s1295_s9  }
  0x1f   : > { %p989_p4 = scmp.ge.s32.totalorder %s1291_s14, 1  ;;  %p174_p5 = scmp.lt.s32.totalorder %s1291_s14, 3 }
  0x20   : > { %s165_s19 = scalar_lea.hbm %s1564_s1, %s1021_s23  ;;  %s157_s25 = scalar_lea.vmem [#allocation6], %s981_s24 }
  0x21   : > { %p1391_p6 = pnand %p989_p4, %p174_p5  ;;  %s166_s26 = sshll.u32 %s157_s25, 4  ;;  %s167_s26 = int_to_ptr.vmem [resolvable:$true] %s166_s26 }
  0x22   : > { %s154_s28 = scalar_lea.sflag [#allocation7], %s1366_s22  ;;  %s1222_s4 = scalar_lea.vmem %s167_s26, 1024 }
  0x23   : > { %p1223_p8 = scmp.ne.s32.totalorder %s167_s26, %s1222_s4  ;;  %s1296_s27 = smov [#allocation6]  }
  0x24   : > { %s1227_s29 = sshll.u32 %s1296_s27, 4  ;;  %s1228_s29 = int_to_ptr.vmem [resolvable:$false] %s1227_s29 }
  0x25   : > { %p1225_p11 = pnand %p1223_p8, %p1183_p10  ;;  %s1229_s3 = scalar_lea.vmem %s1228_s29, 2048 }
  0x26   : > { %p1230_p13 = scmp.lt.s32.totalorder %s167_s26, %s1228_s29  ;;  %p1231_p0 = scmp.lt.s32.totalorder %s1229_s3, %s1222_s4 }
  0x27   : > { %p1226_p12 = pneg %p1225_p11 }
  0x28   : > { %p1232_p1 = por %p1231_p0, %p1230_p13 }
  0x2a   : > { %p1233_p2 = pnand %p1232_p1, %p1226_p12 }
  0x2c   : > { %1236 = shalt.err (!%p1233_p2)
}
  0x2d   : > { %1085 = dma.hbm_to_vmem [thread:$0]  (!%p1377_p9), %s165_s19, 1024, %s167_s26, %s154_s28, %s1294_s8, %s1294_s8, %s1295_s9  }
  0x2e   : > { %178 = sbr.rel (%p1391_p6) target bundleno = 906 (0x38a), region = 28  ;;  %s180_s22 = sand.u32 (!%p1391_p6), 1, %s1275_s10  }
  0x2f   : > { %s990_s23 = sshll.u32 (!%p1391_p6), %s180_s22, 6  ;;  %s181_s24 = scalar_lea.sflag (!%p1391_p6), [#allocation5], %s180_s22 }
  0x30   : > { %s1409_s5 = scalar_lea.vmem (!%p1391_p6), [#allocation4], %s990_s23 }
  0x33   : > { %1262 = dma.done.wait (%p1357_p7), %s181_s24, 1024  }
  0x34   : > { %1264 = vsyncadd (%p1357_p7), %s181_s24, 4294966272  ;;  %s190_s6 = scalar_lea.sflag [#allocation7], %s180_s22  ;;  %s1415_s7 = scalar_lea.vmem [#allocation6], %s990_s23 }
  0x35   : > { %1266 = dma.done.wait (%p1357_p7), %s190_s6, 1024  }
  0x36   : > { %1268 = vsyncadd (%p1357_p7), %s190_s6, 4294966272  ;;  %v232_v0 = vlaneseq  ;;  %v1297_v1 = vmov 0.0   ;;  %v1423_v8 = vld [vmem:[%s1415_s7] sm:$0xff]  ;;  %v1426_v9 = vld [vmem:[%s1415_s7 + $0x8] sm:$0xff]  ;;  %vm292_vm0 = vcmask 130048   ;;  %vm259_vm2 = vcmask 125952  }
  0x37   : > { %1049 = vmatprep.subr.bf16.mxu1 %v1297_v1  ;;  %v280_v12 = vpack.c.bf16 %v1426_v9, %v1423_v8  ;;  %v1434_v18 = vld [vmem:[%s1415_s7 + $0x10] sm:$0xff]  ;;  %v1437_v19 = vld [vmem:[%s1415_s7 + $0x18] sm:$0xff]  ;;  %v1440_v20 = vld [vmem:[%s1415_s7 + $0x20] sm:$0xff]  ;;  %vm1298_vm4 = vmmov 0   ;;  %s1017_s20 = sshll.u32 %s1283_s12, 2  ;;  %vm859_vm8 = vcmask 0  }
  0x38   : > { %v233_v2 = vshrl.u32 %v232_v0, 7  ;;  %v236_v3 = vand.u32 127, %v232_v0  ;;  %v1443_v21 = vld [vmem:[%s1415_s7 + $0x28] sm:$0xff]  ;;  %v281_v23 = vpack.c.bf16 %v1437_v19, %v1434_v18  ;;  %v1453_v25 = vld [vmem:[%s1415_s7 + $0x30] sm:$0xff]  ;;  %v1456_v26 = vld [vmem:[%s1415_s7 + $0x38] sm:$0xff]  ;;  %1051 = vmatprep.mubr.msk.bf16.mxu1 %vm1298_vm4, %v1297_v1  ;;  %p222_p7 = scmp.lt.s32.totalorder %s1283_s12, 1 }
  0x39   : > { %1041 = vmatprep.mubr.msk.bf16.mxu0 %vm292_vm0, %v280_v12  ;;  %v282_v24 = vpack.c.bf16 %v1443_v21, %v1440_v20  ;;  %v283_v27 = vpack.c.bf16 %v1456_v26, %v1453_v25  ;;  %v272_v41 = vld [vmem:[%s1409_s5] sm:$0xff]  ;;  %v273_v43 = vld [vmem:[%s1409_s5 + $0x8] sm:$0xff]  ;;  %v274_v45 = vld [vmem:[%s1409_s5 + $0x10] sm:$0xff] }
  0x3a   : > { %v234_v4 = vadd.s32 8, %v233_v2  ;;  %v237_v5 = vsub.s32 %v233_v2, %v236_v3  ;;  %v1009_v42 = vmul.f32 -1.442695, %v272_v41  ;;  %v1010_v44 = vmul.f32 -1.442695, %v273_v43  ;;  %v275_v47 = vld [vmem:[%s1409_s5 + $0x18] sm:$0xff] }
  0x3b   : > { %v1011_v46 = vmul.f32 -1.442695, %v274_v45  ;;  %v276_v48 = vld [vmem:[%s1409_s5 + $0x20] sm:$0xff]  ;;  %v1012_v49 = vmul.f32 -1.442695, %v275_v47  ;;  %v277_v52 = vld [vmem:[%s1409_s5 + $0x28] sm:$0xff] }
  0x3c   : > { %v238_v6 = vsub.s32 %v234_v4, %v236_v3  ;;  %v240_v7 = vsub.s32 0, %v237_v5  ;;  %1141 = vpow2.f32 %v1009_v42  ;;  %v1013_v50 = vmul.f32 -1.442695, %v276_v48  ;;  %v278_v53 = vld [vmem:[%s1409_s5 + $0x30] sm:$0xff]  ;;  %v279_v58 = vld [vmem:[%s1409_s5 + $0x38] sm:$0xff]  ;;  %s1578_s12 = smov (!%p222_p7, %s1283_s12), 1 }
  0x3d   : > { %1143 = vpow2.f32 %v1010_v44  ;;  %v1014_v55 = vmul.f32 -1.442695, %v277_v52  ;;  %v1015_v56 = vmul.f32 -1.442695, %v278_v53  ;;  %v1016_v61 = vmul.f32 -1.442695, %v279_v58 }
  0x3e   : > { %v993_v10 = vmin.u32 %v240_v7, %v237_v5  ;;  %v243_v11 = vsub.s32 0, %v238_v6  ;;  %1145 = vpow2.f32 %v1011_v46  ;;  %s992_s30 = sshll.u32 %s1578_s12, 3 }
  0x3f   : > { %1147 = vpow2.f32 %v1012_v49  ;;  %s225_s17 = scalar_lea.vmem %s1565_s2, %s992_s30 }
  0x40   : > { %v994_v13 = vmin.u32 %v243_v11, %v238_v6  ;;  %vm245_vm1 = vcmp.le.s32.totalorder %v993_v10, 15  ;;  %1149 = vpow2.f32 %v1013_v50 }
  0x41   : > { %v995_v14 = vsel %vm245_vm1, 1.0, %v1297_v1 }
  0x42   : > { %vm246_vm3 = vcmp.le.s32.totalorder %v994_v13, 15  ;;  %v1024_v15 = vpack.c.bf16 %v995_v14, %v995_v14 }
  0x43   : > { %v996_v16 = vsel %vm246_vm3, 1.0, %v1297_v1 }
  0x44   : > { %v1025_v17 = vpack.c.bf16 %v996_v16, %v996_v16  ;;  %262 = vst.msk [vmem:[#allocation3] sm:$0xf] %vm259_vm2, %v1024_v15  ;;  %260 = vst.msk [vmem:[#allocation2] sm:$0xf] %vm259_vm2, %v1024_v15 }
  0x46   : > { %263 = vst.msk [vmem:[#allocation3 + $0x4] sm:$0xf] %vm259_vm2, %v1025_v17  ;;  %261 = vst.msk [vmem:[#allocation2 + $0x4] sm:$0xf] %vm259_vm2, %v1025_v17 }
  0x49   : > { %v1142_v51 = vpop.eup %1141 }
  0x4a   : > { %v612_v54 = vadd.f32 1.0, %v1142_v51  ;;  %v1144_v57 = vpop.eup %1143 }
  0x4b   : > { %v1146_v59 = vpop.eup %1145  ;;  %v613_v60 = vadd.f32 1.0, %v1144_v57 }
  0x4c   : > { %1151 = vrcp.f32 %v612_v54  ;;  %v1148_v62 = vpop.eup %1147  ;;  %v614_v63 = vadd.f32 1.0, %v1146_v59 }
  0x4d   : > { %v1139_v22 = vld [vmem:[#allocation3] sm:$0xff]   ;;  %v1140_v34 = vld [vmem:[#allocation2] sm:$0xff]   ;;  %1153 = vpow2.f32 %v1014_v55  ;;  %v1150_v0 = vpop.eup %1149  ;;  %v615_v4 = vadd.f32 1.0, %v1148_v62 }
  0x4e   : > { %1039 = vmatprep.subr.bf16.mxu0 %v1139_v22  ;;  %1155 = vpow2.f32 %v1015_v56  ;;  %v616_v6 = vadd.f32 1.0, %v1150_v0 }
  0x4f   : > { %1040 = vmatpush3.bf16.msra.mxu0 %v1139_v22  ;;  %1157 = vrcp.f32 %v613_v60 }
  0x50   : > { %1061 = vmatprep.subr.bf16.mxu0 %v1297_v1  ;;  %1159 = vpow2.f32 %v1016_v61 }
  0x51   : > { %1161 = vrcp.f32 %v614_v63 }
  0x52   : > { %1042 = vmatmul.mubr.msk.bf16.vlgmr.msra.gmra.mxu0 %vm292_vm0, %v281_v23  ;;  %1163 = vrcp.f32 %v615_v4 }
  0x53   : > { %1045 = vmatprep.mubr.msk.bf16.mxu0 %vm292_vm0, %v282_v24  ;;  %1165 = vrcp.f32 %v616_v6 }
  0x59   : > { %v1152_v12 = vpop.eup %1151 }
  0x5a   : > { %1046 = vmatmul.mubr.msk.bf16.gmra.mxu0 %vm292_vm0, %v283_v27  ;;  %v1154_v14 = vpop.eup %1153 }
  0x5b   : > { %1063 = vmatprep.mubr.msk.bf16.mxu0 %vm1298_vm4, %v1297_v1  ;;  %v1156_v17 = vpop.eup %1155 }
 0x112   : > { %v1043_v28 = vpop.f32.mrf.mxu0 }
 0x114   : > { %v339_v29 = vpop.f32.mrf.mxu0 }
 0x116   : > { %v1044_v30 = vpop.f32.mrf.mxu0 }
 0x117   : > { %v373_v36 = vpack.c.bf16 %v1044_v30, %v1043_v28 }
 0x118   : > { %v342_v31 = vpop.f32.mrf.mxu0 }
 0x119   : > { %v372_v32 = vpack.c.bf16 %v342_v31, %v339_v29 }
 0x11a   : > { %v1047_v33 = vpop.f32.mrf.mxu0 }
 0x11b   : > { %1050 = vmatpush3.bf16.msra.mxu1 %v372_v32  ;;  %v617_v32 = vadd.f32 1.0, %v1154_v14 }
 0x11c   : > { %v355_v35 = vpop.f32.mrf.mxu0  ;;  %1055 = vmatprep.subr.bf16.mxu1 %v1297_v1 }
 0x11d   : > { %1167 = vrcp.f32 %v617_v32 }
 0x11e   : > { %v1048_v37 = vpop.f32.mrf.mxu0  ;;  %1052 = vmatmul.mubr.msk.bf16.vlgmr.msra.gmra.mxu1 %vm292_vm0, %v1140_v34 }
 0x11f   : > { %1056 = vmatpush3.bf16.msra.mxu1 %v373_v36  ;;  %1057 = vmatprep.mubr.msk.bf16.mxu1 %vm1298_vm4, %v1297_v1  ;;  %v375_v40 = vpack.c.bf16 %v1048_v37, %v1047_v33  ;;  %v618_v36 = vadd.f32 1.0, %v1156_v17 }
 0x120   : > { %v358_v38 = vpop.f32.mrf.mxu0  ;;  %1067 = vmatprep.subr.bf16.mxu1 %v1297_v1 }
 0x121   : > { %v374_v39 = vpack.c.bf16 %v358_v38, %v355_v35  ;;  %1169 = vrcp.f32 %v618_v36 }
 0x123   : > { %1062 = vmatpush3.bf16.msra.mxu0 %v374_v39 }
 0x126   : > { %1058 = vmatmul.mubr.msk.bf16.vlgmr.msra.gmra.mxu1 %vm292_vm0, %v1140_v34  ;;  %1064 = vmatmul.mubr.msk.bf16.vlgmr.msra.gmra.mxu0 %vm292_vm0, %v1140_v34 }
 0x127   : > { %1068 = vmatpush3.bf16.msra.mxu1 %v375_v40  ;;  %1069 = vmatprep.mubr.msk.bf16.mxu1 %vm1298_vm4, %v1297_v1  ;;  %v1158_v40 = vpop.eup %1157 }
 0x128   : > { %v1160_v50 = vpop.eup %1159 }
 0x129   : > { %v1162_v53 = vpop.eup %1161 }
 0x12e   : > { %1070 = vmatmul.mubr.msk.bf16.vlgmr.msra.gmra.mxu1 %vm292_vm0, %v1140_v34 }
 0x1de   : > { %v418_v1 = vpop.f32.mrf.mxu1 }
 0x1df   : > { %v548_v2 = vmul.f32 0.0010405828, %v418_v1 }
 0x1e0   : > { %v1053_v3 = vpop.f32.mrf.mxu1 }
 0x1e1   : > { %v556_v5 = vsub.f32 %v548_v2, %v1423_v8  ;;  %v619_v2 = vadd.f32 1.0, %v1160_v50  ;;  %v1164_v3 = vpop.eup %1163 }
 0x1e2   : > { %v421_v7 = vpop.f32.mrf.mxu1 }
 0x1e3   : > { %v564_v10 = vand.u32 2147483647, %v556_v5  ;;  %v549_v11 = vmul.f32 0.0010405828, %v421_v7  ;;  %1171 = vrcp.f32 %v619_v2 }
 0x1e4   : > { %v1054_v13 = vpop.f32.mrf.mxu1 }
 0x1e5   : > { %v572_v15 = vmul.f32 5.0, %v564_v10  ;;  %v557_v16 = vsub.f32 %v549_v11, %v1426_v9  ;;  %v1166_v10 = vpop.eup %1165 }
 0x1e6   : > { %v459_v22 = vpop.f32.mrf.mxu1  ;;  %v500_v23 = vpop.f32.mrf.mxu0 }
 0x1e7   : > { %v565_v24 = vand.u32 2147483647, %v557_v16  ;;  %v550_v27 = vmul.f32 0.0010405828, %v459_v22  ;;  %v580_v28 = vadd.f32 1.0, %v572_v15  ;;  %v1168_v36 = vpop.eup %1167 }
 0x1e8   : > { %v1059_v29 = vpop.f32.mrf.mxu1  ;;  %v552_v30 = vmul.f32 0.0010405828, %v500_v23  ;;  %v1065_v31 = vpop.f32.mrf.mxu0 }
 0x1e9   : > { %v573_v33 = vmul.f32 5.0, %v565_v24  ;;  %v558_v34 = vsub.f32 %v550_v27, %v1434_v18  ;;  %v1486_v35 = vmul.f32 %v1152_v12, %v580_v28  ;;  %v756_v44 = vmul.f32 %v580_v28, %v1423_v8 }
 0x1ea   : > { %v462_v37 = vpop.f32.mrf.mxu1  ;;  %v560_v38 = vsub.f32 %v552_v30, %v1440_v20  ;;  %v503_v39 = vpop.f32.mrf.mxu0 }
 0x1eb   : > { %v566_v41 = vand.u32 2147483647, %v558_v34  ;;  %v551_v42 = vmul.f32 0.0010405828, %v462_v37  ;;  %v704_v43 = vsel %vm292_vm0, %v1486_v35, 0.0  ;;  %v581_v47 = vadd.f32 1.0, %v573_v33 }
 0x1ec   : > { %705 = vadd.xlane.f32.xlu0 %v704_v43  ;;  %v1060_v45 = vpop.f32.mrf.mxu1  ;;  %v568_v46 = vand.u32 2147483647, %v560_v38  ;;  %v553_v48 = vmul.f32 0.0010405828, %v503_v39  ;;  %v1066_v49 = vpop.f32.mrf.mxu0  ;;  %v764_v61 = vsel %vm292_vm0, %v756_v44, 0.0 }
 0x1ed   : > { %v574_v51 = vmul.f32 5.0, %v566_v41  ;;  %v559_v52 = vsub.f32 %v551_v42, %v1437_v19  ;;  %v757_v55 = vmul.f32 %v581_v47, %v1426_v9  ;;  %v1495_v57 = vmul.f32 %v1158_v40, %v581_v47  ;;  %v1170_v39 = vpop.eup %1169 }
 0x1ee   : > { %v576_v54 = vmul.f32 5.0, %v568_v46  ;;  %v561_v56 = vsub.f32 %v553_v48, %v1443_v21  ;;  %v541_v58 = vpop.f32.mrf.mxu1 }
 0x1ef   : > { %v582_v59 = vadd.f32 1.0, %v574_v51  ;;  %v567_v60 = vand.u32 2147483647, %v559_v52  ;;  %v554_v62 = vmul.f32 0.0010405828, %v541_v58  ;;  %v767_v63 = vsel %vm292_vm0, %v757_v55, 0.0 }
 0x1f0   : > { %765 = vadd.xlane.f32.xlu0 %v764_v61  ;;  %v569_v0 = vand.u32 2147483647, %v561_v56  ;;  %v1071_v1 = vpop.f32.mrf.mxu1  ;;  %v584_v5 = vadd.f32 1.0, %v576_v54  ;;  %768 = vadd.xlane.f32.xlu1 %v767_v63  ;;  %v707_v11 = vsel %vm292_vm0, %v1495_v57, 0.0  ;;  %v1172_v49 = vpop.eup %1171  ;;  %v644_v55 = vmul.f32 %v1486_v35, %v1423_v8 }
 0x1f1   : > { %v575_v4 = vmul.f32 5.0, %v567_v60  ;;  %v638_v6 = vmul.f32 %v1162_v53, %v582_v59  ;;  %v562_v7 = vsub.f32 %v554_v62, %v1453_v25  ;;  %v758_v16 = vmul.f32 %v582_v59, %v1434_v18 }
 0x1f2   : > { %v544_v12 = vpop.f32.mrf.mxu1  ;;  %v577_v17 = vmul.f32 5.0, %v569_v0  ;;  %v640_v28 = vmul.f32 %v1166_v10, %v584_v5  ;;  %v760_v40 = vmul.f32 %v584_v5, %v1440_v20  ;;  %v652_v59 = vsel %vm292_vm0, %v644_v55, 0.0 }
 0x1f3   : > { %v583_v13 = vadd.f32 1.0, %v575_v4  ;;  %v710_v14 = vsel %vm292_vm0, %v638_v6, 0.0  ;;  %v570_v15 = vand.u32 2147483647, %v562_v7  ;;  %v555_v22 = vmul.f32 0.0010405828, %v544_v12 }
 0x1f4   : > { %708 = vadd.xlane.f32.xlu0 %v707_v11  ;;  %v1072_v23 = vpop.f32.mrf.mxu1  ;;  %711 = vadd.xlane.f32.xlu1 %v710_v14  ;;  %v770_v30 = vsel %vm292_vm0, %v758_v16, 0.0  ;;  %v585_v32 = vadd.f32 1.0, %v577_v17  ;;  %v716_v38 = vsel %vm292_vm0, %v640_v28, 0.0  ;;  %v776_v45 = vsel %vm292_vm0, %v760_v40, 0.0 }
 0x1f5   : > { %v578_v24 = vmul.f32 5.0, %v570_v15  ;;  %v639_v27 = vmul.f32 %v1164_v3, %v583_v13  ;;  %v563_v29 = vsub.f32 %v555_v22, %v1456_v26  ;;  %v759_v34 = vmul.f32 %v583_v13, %v1437_v19 }
 0x1f6   : > { %v641_v43 = vmul.f32 %v1168_v36, %v585_v32  ;;  %v761_v48 = vmul.f32 %v585_v32, %v1443_v21  ;;  %v646_v60 = vmul.f32 %v638_v6, %v1434_v18  ;;  %v645_v62 = vmul.f32 %v1495_v57, %v1426_v9 }
 0x1f7   : > { %v713_v31 = vsel %vm292_vm0, %v639_v27, 0.0  ;;  %v571_v33 = vand.u32 2147483647, %v563_v29  ;;  %v586_v37 = vadd.f32 1.0, %v578_v24  ;;  %v773_v42 = vsel %vm292_vm0, %v759_v34, 0.0 }
 0x1f8   : > { %771 = vadd.xlane.f32.xlu0 %v770_v30  ;;  %714 = vadd.xlane.f32.xlu1 %v713_v31  ;;  %v719_v47 = vsel %vm292_vm0, %v641_v43, 0.0  ;;  %v779_v52 = vsel %vm292_vm0, %v761_v48, 0.0  ;;  %v658_v63 = vsel %vm292_vm0, %v646_v60, 0.0  ;;  %v648_v8 = vmul.f32 %v640_v28, %v1440_v20 }
 0x1f9   : > { %v579_v41 = vmul.f32 5.0, %v571_v33  ;;  %v642_v44 = vmul.f32 %v1170_v39, %v586_v37  ;;  %v762_v51 = vmul.f32 %v586_v37, %v1453_v25  ;;  %v655_v35 = vsel %vm292_vm0, %v645_v62, 0.0 }
 0x1fa   : > { %v647_v0 = vmul.f32 %v639_v27, %v1437_v19  ;;  %v664_v1 = vsel %vm292_vm0, %v648_v8, 0.0  ;;  %v649_v9 = vmul.f32 %v641_v43, %v1443_v21 }
 0x1fb   : > { %v587_v46 = vadd.f32 1.0, %v579_v41  ;;  %v722_v50 = vsel %vm292_vm0, %v642_v44, 0.0  ;;  %v782_v54 = vsel %vm292_vm0, %v762_v51, 0.0  ;;  %v650_v18 = vmul.f32 %v642_v44, %v1453_v25 }
 0x1fc   : > { %717 = vadd.xlane.f32.xlu0 %v716_v38  ;;  %774 = vadd.xlane.f32.xlu1 %v773_v42  ;;  %v661_v2 = vsel %vm292_vm0, %v647_v0, 0.0  ;;  %v667_v20 = vsel %vm292_vm0, %v649_v9, 0.0 }
 0x1fd   : > { %v643_v53 = vmul.f32 %v1172_v49, %v587_v46  ;;  %v763_v58 = vmul.f32 %v587_v46, %v1456_v26  ;;  %v670_v57 = vsel %vm292_vm0, %v650_v18, 0.0 }
 0x1ff   : > { %v725_v56 = vsel %vm292_vm0, %v643_v53, 0.0  ;;  %v785_v61 = vsel %vm292_vm0, %v763_v58, 0.0  ;;  %v651_v3 = vmul.f32 %v643_v53, %v1456_v26 }
 0x200   : > { %777 = vadd.xlane.f32.xlu0 %v776_v45  ;;  %720 = vadd.xlane.f32.xlu1 %v719_v47 }
 0x201   : > { %v673_v19 = vsel %vm292_vm0, %v651_v3, 0.0 }
 0x204   : > { %723 = vadd.xlane.f32.xlu0 %v722_v50  ;;  %780 = vadd.xlane.f32.xlu1 %v779_v52 }
 0x208   : > { %783 = vadd.xlane.f32.xlu0 %v782_v54  ;;  %726 = vadd.xlane.f32.xlu1 %v725_v56 }
 0x20c   : > { %653 = vadd.xlane.f32.xlu0 %v652_v59  ;;  %786 = vadd.xlane.f32.xlu1 %v785_v61 }
 0x210   : > { %659 = vadd.xlane.f32.xlu0 %v658_v63  ;;  %656 = vadd.xlane.f32.xlu1 %v655_v35 }
 0x214   : > { %665 = vadd.xlane.f32.xlu0 %v664_v1  ;;  %662 = vadd.xlane.f32.xlu1 %v661_v2 }
 0x218   : > { %671 = vadd.xlane.f32.xlu0 %v670_v57  ;;  %668 = vadd.xlane.f32.xlu1 %v667_v20 }
 0x21c   : > { %674 = vadd.xlane.f32.xlu1 %v673_v19 }
 0x275   : > { %v706_v4 = vpop.xlane.xlu0 %705 }
 0x279   : > { %v766_v5 = vpop.xlane.xlu0 %765  ;;  %v769_v25 = vpop.xlane.xlu1 %768 }
 0x27a   : > { %v788_v11 = vadd.f32 %v769_v25, %v766_v5 }
 0x27c   : > { %v789_v14 = vrot.slane %v788_v11, 4 }
 0x27d   : > { %v709_v6 = vpop.xlane.xlu0 %708  ;;  %v712_v10 = vpop.xlane.xlu1 %711 }
 0x27e   : > { %v728_v7 = vadd.f32 %v709_v6, %v706_v4  ;;  %v790_v23 = vadd.f32 %v789_v14, %v788_v11 }
 0x280   : > { %v729_v21 = vrot.slane %v728_v7, 4  ;;  %v791_v32 = vrot.slane %v790_v23, 2 }
 0x281   : > { %v772_v12 = vpop.xlane.xlu0 %771  ;;  %v715_v13 = vpop.xlane.xlu1 %714 }
 0x282   : > { %v735_v15 = vadd.f32 %v715_v13, %v712_v10  ;;  %v730_v16 = vadd.f32 %v729_v21, %v728_v7  ;;  %v792_v42 = vadd.f32 %v791_v32, %v790_v23 }
 0x284   : > { %v736_v17 = vrot.slane %v735_v15, 4  ;;  %v731_v27 = vrot.slane %v730_v16, 2  ;;  %v793_v52 = vrot.slane %v792_v42, 1 }
 0x285   : > { %v718_v22 = vpop.xlane.xlu0 %717  ;;  %v775_v26 = vpop.xlane.xlu1 %774 }
 0x286   : > { %v795_v24 = vadd.f32 %v775_v26, %v772_v12  ;;  %v737_v28 = vadd.f32 %v736_v17, %v735_v15  ;;  %v732_v36 = vadd.f32 %v731_v27, %v730_v16  ;;  %v794_v8 = vadd.f32 %v793_v52, %v792_v42 }
 0x288   : > { %v796_v29 = vrot.slane %v795_v24, 4  ;;  %v738_v37 = vrot.slane %v737_v28, 2  ;;  %v733_v46 = vrot.slane %v732_v36, 1 }
 0x289   : > { %v778_v30 = vpop.xlane.xlu0 %777  ;;  %v721_v31 = vpop.xlane.xlu1 %720 }
 0x28a   : > { %v797_v33 = vadd.f32 %v796_v29, %v795_v24  ;;  %v742_v34 = vadd.f32 %v721_v31, %v718_v22  ;;  %v739_v47 = vadd.f32 %v738_v37, %v737_v28  ;;  %v734_v58 = vadd.f32 %v733_v46, %v732_v36 }
 0x28c   : > { %v798_v38 = vrot.slane %v797_v33, 2  ;;  %v743_v39 = vrot.slane %v742_v34, 4  ;;  %v740_v59 = vrot.slane %v739_v47, 1  ;;  %v816_v9 = vadd.f32 %v794_v8, %v734_v58 }
 0x28d   : > { %v724_v40 = vpop.xlane.xlu0 %723  ;;  %v781_v41 = vpop.xlane.xlu1 %780 }
 0x28e   : > { %v799_v43 = vadd.f32 %v798_v38, %v797_v33  ;;  %v744_v44 = vadd.f32 %v743_v39, %v742_v34  ;;  %v802_v45 = vadd.f32 %v781_v41, %v778_v30  ;;  %v741_v57 = vadd.f32 %v740_v59, %v739_v47 }
 0x28f   : > { %v828_v12 = vadd.f32 0.5, %v816_v9 }
 0x290   : > { %v745_v48 = vrot.slane %v744_v44, 2  ;;  %v803_v49 = vrot.slane %v802_v45, 4  ;;  %v800_v53 = vrot.slane %v799_v43, 1 }
 0x291   : > { %v784_v50 = vpop.xlane.xlu0 %783  ;;  %v727_v51 = vpop.xlane.xlu1 %726  ;;  %1173 = vrcp.f32 %v828_v12 }
 0x292   : > { %v804_v54 = vadd.f32 %v803_v49, %v802_v45  ;;  %v749_v55 = vadd.f32 %v727_v51, %v724_v40  ;;  %v746_v56 = vadd.f32 %v745_v48, %v744_v44  ;;  %v801_v35 = vadd.f32 %v800_v53, %v799_v43 }
 0x294   : > { %v805_v60 = vrot.slane %v804_v54, 2  ;;  %v750_v61 = vrot.slane %v749_v55, 4  ;;  %v747_v18 = vrot.slane %v746_v56, 1  ;;  %v817_v25 = vadd.f32 %v801_v35, %v741_v57 }
 0x295   : > { %v654_v62 = vpop.xlane.xlu0 %653  ;;  %v787_v63 = vpop.xlane.xlu1 %786 }
 0x296   : > { %v806_v0 = vadd.f32 %v805_v60, %v804_v54  ;;  %v751_v1 = vadd.f32 %v750_v61, %v749_v55  ;;  %v809_v2 = vadd.f32 %v787_v63, %v784_v50  ;;  %v748_v10 = vadd.f32 %v747_v18, %v746_v56 }
 0x297   : > { %v829_v17 = vadd.f32 0.5, %v817_v25 }
 0x298   : > { %v807_v20 = vrot.slane %v806_v0, 1  ;;  %v752_v3 = vrot.slane %v751_v1, 2  ;;  %v810_v19 = vrot.slane %v809_v2, 4 }
 0x299   : > { %v660_v4 = vpop.xlane.xlu0 %659  ;;  %v657_v5 = vpop.xlane.xlu1 %656  ;;  %1175 = vrcp.f32 %v829_v17 }
 0x29a   : > { %v808_v6 = vadd.f32 %v807_v20, %v806_v0  ;;  %v676_v7 = vadd.f32 %v657_v5, %v654_v62  ;;  %v753_v11 = vadd.f32 %v752_v3, %v751_v1  ;;  %v811_v21 = vadd.f32 %v810_v19, %v809_v2 }
 0x29b   : > { %v846_v62 = vstv %s1017_s20 }
 0x29c   : > { %v677_v13 = vrot.slane %v676_v7, 4  ;;  %v818_v14 = vadd.f32 %v808_v6, %v748_v10  ;;  %v812_v15 = vrot.slane %v811_v21, 2  ;;  %v754_v23 = vrot.slane %v753_v11, 1 }
 0x29d   : > { %v663_v16 = vpop.xlane.xlu1 %662  ;;  %v666_v27 = vpop.xlane.xlu0 %665  ;;  %v847_v8 = vadd.s32 1, %v846_v62  ;;  %v848_v3 = vadd.s32 2, %v846_v62  ;;  %vm850_vm6 = vcmp.lt.s32.totalorder %v846_v62, 8 }
 0x29e   : > { %v678_v22 = vadd.f32 %v677_v13, %v676_v7  ;;  %v683_v26 = vadd.f32 %v663_v16, %v660_v4  ;;  %v813_v24 = vadd.f32 %v812_v15, %v811_v21  ;;  %v830_v30 = vadd.f32 0.5, %v818_v14  ;;  %v1174_v63 = vpop.eup %1173 }
 0x29f   : > { %v755_v37 = vadd.f32 %v754_v23, %v753_v11  ;;  %vm851_vm5 = vcmp.lt.s32.totalorder %v847_v8, 8  ;;  %v849_v21 = vadd.s32 3, %v846_v62  ;;  %vm852_vm7 = vcmp.lt.s32.totalorder %v848_v3, 8 }
 0x2a0   : > { %v679_v28 = vrot.slane %v678_v22, 2  ;;  %v684_v29 = vrot.slane %v683_v26, 4  ;;  %v814_v31 = vrot.slane %v813_v24, 1  ;;  %1177 = vrcp.f32 %v830_v30 }
 0x2a1   : > { %v669_v32 = vpop.xlane.xlu1 %668  ;;  %v672_v43 = vpop.xlane.xlu0 %671  ;;  %vm853_vm9 = vcmp.lt.s32.totalorder %v849_v21, 8 }
 0x2a2   : > { %v680_v33 = vadd.f32 %v679_v28, %v678_v22  ;;  %v685_v34 = vadd.f32 %v684_v29, %v683_v26  ;;  %v690_v36 = vadd.f32 %v669_v32, %v666_v27  ;;  %v815_v38 = vadd.f32 %v814_v31, %v813_v24 }
 0x2a4   : > { %v681_v39 = vrot.slane %v680_v33, 1  ;;  %v686_v40 = vrot.slane %v685_v34, 2  ;;  %v691_v41 = vrot.slane %v690_v36, 4  ;;  %v819_v42 = vadd.f32 %v815_v38, %v755_v37 }
 0x2a5   : > { %v675_v44 = vpop.xlane.xlu1 %674 }
 0x2a6   : > { %v682_v45 = vadd.f32 %v681_v39, %v680_v33  ;;  %v687_v46 = vadd.f32 %v686_v40, %v685_v34  ;;  %v692_v47 = vadd.f32 %v691_v41, %v690_v36  ;;  %v697_v48 = vadd.f32 %v675_v44, %v672_v43  ;;  %v1176_v2 = vpop.eup %1175 }
 0x2a7   : > { %v831_v49 = vadd.f32 0.5, %v819_v42 }
 0x2a8   : > { %v820_v50 = vmul.f32 2.0, %v682_v45  ;;  %v688_v51 = vrot.slane %v687_v46, 1  ;;  %v693_v52 = vrot.slane %v692_v47, 2  ;;  %v698_v53 = vrot.slane %v697_v48, 4 }
 0x2a9   : > { %1179 = vrcp.f32 %v831_v49 }
 0x2aa   : > { %v824_v54 = vadd.f32 0.5, %v820_v50  ;;  %v689_v55 = vadd.f32 %v688_v51, %v687_v46  ;;  %v694_v56 = vadd.f32 %v693_v52, %v692_v47  ;;  %v699_v58 = vadd.f32 %v698_v53, %v697_v48 }
 0x2ac   : > { %v821_v59 = vmul.f32 2.0, %v689_v55  ;;  %v695_v60 = vrot.slane %v694_v56, 1  ;;  %v700_v61 = vrot.slane %v699_v58, 2  ;;  %v836_v35 = vmul.f32 %v1174_v63, %v824_v54 }
 0x2ad   : > { %v1178_v19 = vpop.eup %1177 }
 0x2ae   : > { %v825_v0 = vadd.f32 0.5, %v821_v59  ;;  %v696_v1 = vadd.f32 %v695_v60, %v694_v56  ;;  %v701_v18 = vadd.f32 %v700_v61, %v699_v58  ;;  %v840_v25 = vsub.f32 1.0, %v836_v35 }
 0x2b0   : > { %v837_v9 = vmul.f32 %v1176_v2, %v825_v0  ;;  %v822_v57 = vmul.f32 2.0, %v696_v1  ;;  %v702_v20 = vrot.slane %v701_v18, 1  ;;  %v854_v15 = vsel %vm850_vm6, %v840_v25, 0.0 }
 0x2b1   : > { %v860_v26 = vsel %vm859_vm8, %v854_v15, 0.0 }
 0x2b2   : > { %v826_v4 = vadd.f32 0.5, %v822_v57  ;;  %v703_v5 = vadd.f32 %v702_v20, %v701_v18  ;;  %v841_v6 = vsub.f32 1.0, %v837_v9 }
 0x2b4   : > { %v823_v7 = vmul.f32 2.0, %v703_v5  ;;  %v838_v10 = vmul.f32 %v1178_v19, %v826_v4  ;;  %v855_v11 = vsel %vm851_vm5, %v841_v6, 0.0 }
 0x2b5   : > { %v861_v16 = vsel %vm859_vm8, %v855_v11, 0.0 }
 0x2b6   : > { %v1180_v12 = vpop.eup %1179  ;;  %v827_v13 = vadd.f32 0.5, %v823_v7  ;;  %v842_v14 = vsub.f32 1.0, %v838_v10  ;;  %v862_v27 = vadd.f32 %v861_v16, %v860_v26 }
 0x2b8   : > { %v839_v17 = vmul.f32 %v1180_v12, %v827_v13  ;;  %v856_v22 = vsel %vm852_vm7, %v842_v14, 0.0 }
 0x2b9   : > { %v863_v23 = vsel %vm859_vm8, %v856_v22, 0.0 }
 0x2ba   : > { %v843_v24 = vsub.f32 1.0, %v839_v17  ;;  %v864_v29 = vadd.f32 %v863_v23, %v862_v27 }
 0x2bc   : > { %v857_v28 = vsel %vm853_vm9, %v843_v24, 0.0 }
 0x2bd   : > { %v865_v30 = vsel %vm859_vm8, %v857_v28, 0.0 }
 0x2be   : > { %v866_v31 = vadd.f32 %v865_v30, %v864_v29 }
 0x2c0   : > { %867 = vadd.xlane.f32.xlu0 %v866_v31 }
 0x349   : > { %v868_v32 = vpop.xlane.xlu0 %867 }
 0x34a   : > { %v869_v33 = vrot.slane %v868_v32, 4 }
 0x34c   : > { %v870_v34 = vadd.f32 %v869_v33, %v868_v32 }
 0x34e   : > { %v871_v36 = vrot.slane %v870_v34, 2 }
 0x350   : > { %v872_v37 = vadd.f32 %v871_v36, %v870_v34 }
 0x352   : > { %v873_v38 = vrot.slane %v872_v37, 1 }
 0x354   : > { %v874_v39 = vadd.f32 %v873_v38, %v872_v37 }
 0x356   : > { %1073 = vpush %v874_v39 }
 0x387   : > { %s1074_s8 = spop %1073 }
 0x388   : > { %v876_v40 = vstv %s1074_s8 }
 0x389   : > { %878 = vst [vmem:[%s225_s17] sm:$0xff] %v876_v40 }
 0x38a PF: > { %s18_s14 = sadd.s32 1, %s1291_s14   ;;  %s1570_s9 = smov %s1275_s10 }
 0x38b   : > { %p15_p9 = scmp.ge.s32.totalorder %s18_s14, 4   ;;  %s1571_s10 = smov %s1279_s11 }
 0x38c   : > { %s1572_s11 = smov %s1363_s21  ;;  %s1573_s12 = smov %s1287_s13 }
 0x38d   : > { %s1574_s13 = smov %s1576_s16  ;;  %17 = sbr.rel (!%p15_p9) target bundleno = 6 (0x6), region = 85 }
 0x392   :  { %898 = vsyncpa [#allocation5], 1 }
 0x393   :  { %900 = vsyncpa [#allocation5 + $0x1], 1 }
 0x394   :  { %901 = vsyncpa [#allocation7], 1 }
 0x395   :  { %903 = vsyncpa [#allocation7 + $0x1], 1 }

</bundles_post_ra>
